<compile_context>
chip_gen: v5e
topology: v5e:2x2
jax: 0.10.0
libtpu: 0.0.40
codegen_flags: <defaults>
</compile_context>

<pallas_src>
import jax
import jax.numpy as jnp
from jax.experimental import pallas as pl
from jax.experimental.pallas import tpu as pltpu


def _round_up(x, m):
    return ((x + m - 1) // m) * m


# ----------------------------------------------------------------------------
# Pass 1: X2 = (relu(A_hat @ X1 + b1)) @ W2        (X1 = Z @ W1, precomputed)
# ----------------------------------------------------------------------------
def _gcn1_kernel(a_ref, x1_ref, b1_ref, w2_ref, x2_ref, acc_ref):
    k = pl.program_id(1)

    @pl.when(k == 0)
    def _():
        acc_ref[...] = jnp.zeros_like(acc_ref)

    tk = a_ref.shape[1]
    off = pl.multiple_of(k * tk, tk)
    acc_ref[...] += jnp.dot(a_ref[...], x1_ref[pl.ds(off, tk), :],
                            preferred_element_type=jnp.float32)

    @pl.when(k == pl.num_programs(1) - 1)
    def _():
        h1 = jnp.maximum(acc_ref[...] + b1_ref[...], 0.0)          # f32 VPU
        x2_ref[...] = jnp.dot(h1.astype(jnp.bfloat16), w2_ref[...],
                              preferred_element_type=jnp.float32
                              ).astype(x2_ref.dtype)


# ----------------------------------------------------------------------------
# Pass 2: out = (A_hat @ X2 + b2) @ Wfc + bfc
# ----------------------------------------------------------------------------
def _gcn2_fc_kernel(a_ref, x2_ref, b2_ref, wfc_ref, bfc_ref, o_ref, acc_ref):
    k = pl.program_id(1)

    @pl.when(k == 0)
    def _():
        acc_ref[...] = jnp.zeros_like(acc_ref)

    tk = a_ref.shape[1]
    off = pl.multiple_of(k * tk, tk)
    acc_ref[...] += jnp.dot(a_ref[...], x2_ref[pl.ds(off, tk), :],
                            preferred_element_type=jnp.float32)

    @pl.when(k == pl.num_programs(1) - 1)
    def _():
        h2 = (acc_ref[...] + b2_ref[...]).astype(jnp.bfloat16)
        o_ref[...] = (jnp.dot(h2, wfc_ref[...],
                              preferred_element_type=jnp.float32)
                      + bfc_ref[...]).astype(o_ref.dtype)


# ----------------------------------------------------------------------------
# Wrapper: padding, tile selection, two pallas_calls.
# ----------------------------------------------------------------------------
def decoder_forward(a_hat, z, w1, b1, w2, b2, wfc, bfc, *, tm=256, tk=512):
    n = z.shape[0]
    c1 = w1.shape[1]            # 2 * out_channels
    c2 = w2.shape[1]            # out_channels
    fc_out = wfc.shape[1]

    # --- tile / padding selection (tiles multiples of (8,128); tm | tk) ------
    if n >= tk:
        npad = _round_up(n, tk)
    else:
        npad = _round_up(n, 128)
        tk = npad
    if tk % tm != 0:
        tm = tk
    grid = (npad // tm, npad // tk)
    pad_n = npad - n

    # --- plain-JAX glue (tiny, not the hot path) ------------------------------
    a_pad = jnp.pad(a_hat, ((0, pad_n), (0, pad_n))).astype(jnp.bfloat16)
    z_pad = jnp.pad(z, ((0, pad_n), (0, 0)))
    x1 = (z_pad @ w1).astype(jnp.bfloat16)          # [npad, c1], row-local
    w2_b = w2.astype(jnp.bfloat16)
    wfc_b = wfc.astype(jnp.bfloat16)

    cparams = pltpu.CompilerParams(
        dimension_semantics=("parallel", "arbitrary"),   # rows parallel (v7x)
        vmem_limit_bytes=32 * 1024 * 1024,               # headroom on all chips
    )

    def resident(shape):
        # constant index_map -> fetched once, stays VMEM-resident for the grid
        return pl.BlockSpec(shape, lambda i, k: (0,) * len(shape))

    # --- pass 1: X2 = relu(A @ X1 + b1) @ W2 ----------------------------------
    x2 = pl.pallas_call(
        _gcn1_kernel,
        out_shape=jax.ShapeDtypeStruct((npad, c2), jnp.bfloat16),
        grid=grid,
        in_specs=[
            pl.BlockSpec((tm, tk), lambda i, k: (i, k)),   # A_hat tiles (stream)
            resident((npad, c1)),                          # X1 (bf16)
            resident((1, c1)),                             # b1 (f32)
            resident((c1, c2)),                            # W2 (bf16)
        ],
        out_specs=pl.BlockSpec((tm, c2), lambda i, k: (i, 0)),
        scratch_shapes=[pltpu.VMEM((tm, c1), jnp.float32)],
        compiler_params=cparams,
    )(a_pad, x1, b1, w2_b)

    # --- pass 2: out = (A @ X2 + b2) @ Wfc + bfc ------------------------------
    out = pl.pallas_call(
        _gcn2_fc_kernel,
        out_shape=jax.ShapeDtypeStruct((npad, fc_out), jnp.float32),
        grid=grid,
        in_specs=[
            pl.BlockSpec((tm, tk), lambda i, k: (i, k)),   # A_hat tiles (stream)
            resident((npad, c2)),                          # X2 (bf16)
            resident((1, c2)),                             # b2 (f32)
            resident((c2, fc_out)),                        # Wfc (bf16)
            resident((1, fc_out)),                         # bfc (f32)
        ],
        out_specs=pl.BlockSpec((tm, fc_out), lambda i, k: (i, 0)),
        scratch_shapes=[pltpu.VMEM((tm, c2), jnp.float32)],
        compiler_params=cparams,
    )(a_pad, x2, b2, wfc_b, bfc)

    return out[:n]


# ----------------------------------------------------------------------------
# Plain-JAX glue: GCN symmetric normalization with self-loops -> dense A_hat.
# ----------------------------------------------------------------------------
def gcn_norm_dense_adj(edge_index, num_nodes):
    src = edge_index[0]
    dst = edge_index[1]
    loop = jnp.arange(num_nodes, dtype=edge_index.dtype)
    src = jnp.concatenate([src, loop])
    dst = jnp.concatenate([dst, loop])
    deg = jnp.zeros((num_nodes,), jnp.float32).at[dst].add(1.0)
    dinv = jnp.where(deg > 0, 1.0 / jnp.sqrt(deg), 0.0)
    norm = dinv[src] * dinv[dst]
    a_hat = jnp.zeros((num_nodes, num_nodes), jnp.float32).at[dst, src].add(norm)
    return a_hat


def reference_forward(a_hat, z, w1, b1, w2, b2, wfc, bfc):
    h = jax.nn.relu(a_hat @ (z @ w1) + b1)
    h = a_hat @ (h @ w2) + b2
    return h @ wfc + bfc


def reference_forward_bf16(a_hat, z, w1, b1, w2, b2, wfc, bfc):
    # Mirrors the kernel's bf16 operands / f32 accumulation exactly.
    bf = jnp.bfloat16
    a = a_hat.astype(bf)
    x1 = (z @ w1).astype(bf)
    h1 = jnp.maximum(jnp.dot(a, x1, preferred_element_type=jnp.float32) + b1, 0.0)
    x2 = jnp.dot(h1.astype(bf), w2.astype(bf),
                 preferred_element_type=jnp.float32).astype(bf)
    h2 = jnp.dot(a, x2, preferred_element_type=jnp.float32) + b2
    return (jnp.dot(h2.astype(bf), wfc.astype(bf),
                    preferred_element_type=jnp.float32) + bfc)


if __name__ == "__main__":
    IN_CH = 8
    OUT_CH = 16          # conv1 width = 2 * OUT_CH = 32, fc output = 1024
    FC_OUT = 1024

    key = jax.random.PRNGKey(0)
    k_z, k_w1, k_w2, k_wfc, k_bfc, k_z2 = jax.random.split(key, 6)

    def glorot(k, shape):
        lim = jnp.sqrt(6.0 / (shape[0] + shape[1]))
        return jax.random.uniform(k, shape, jnp.float32, -lim, lim)

    w1 = glorot(k_w1, (IN_CH, 2 * OUT_CH))
    b1 = jnp.zeros((1, 2 * OUT_CH), jnp.float32)
    w2 = glorot(k_w2, (2 * OUT_CH, OUT_CH))
    b2 = jnp.zeros((1, OUT_CH), jnp.float32)
    lim_fc = 1.0 / jnp.sqrt(jnp.float32(OUT_CH))
    wfc = jax.random.uniform(k_wfc, (OUT_CH, FC_OUT), jnp.float32, -lim_fc, lim_fc)
    bfc = jax.random.uniform(k_bfc, (1, FC_OUT), jnp.float32, -lim_fc, lim_fc)
    params = (w1, b1, w2, b2, wfc, bfc)

    def run_check(n, kz):
        # Node features + deterministic undirected ring graph.
        z = jax.random.normal(kz, (n, IN_CH), jnp.float32)
        idx = jnp.arange(n, dtype=jnp.int32)
        nxt = (idx + 1) % n
        edge_index = jnp.stack([jnp.concatenate([idx, nxt]),
                                jnp.concatenate([nxt, idx])], axis=0)
        a_hat = gcn_norm_dense_adj(edge_index, n)

        out = decoder_forward(a_hat, z, *params)
        out = jax.block_until_ready(out)
        assert out.shape == (n, FC_OUT)

        # Tight check against a reference that mirrors the bf16/f32-acc math.
        ref_bf16 = reference_forward_bf16(a_hat, z, *params)
        assert jnp.allclose(out, ref_bf16, atol=1e-2, rtol=1e-2)

        # Loose sanity check against the full-f32 reference.
        ref_f32 = reference_forward(a_hat, z, *params)
        assert jnp.allclose(out, ref_f32, atol=2e-1, rtol=2e-1)

    # Small demo shape (single-tile grid).
    run_check(16, k_z)
    # Multi-tile path: grid=(4, 2) exercises padding + K-accumulation + bf16 A stream.
    run_check(640, k_z2)

    print("KERNEL_OK")
</pallas_src>

<mosaic_0001>
module attributes {stable_mosaic.version = 11 : i64} {
  func.func @_gcn1_kernel(%arg0: i32, %arg1: i32, %arg2: memref<128x128xbf16, #tpu.memory_space<vmem>>, %arg3: memref<128x32xbf16, #tpu.memory_space<vmem>>, %arg4: memref<1x32xf32, #tpu.memory_space<vmem>>, %arg5: memref<32x16xbf16, #tpu.memory_space<vmem>>, %arg6: memref<128x16xbf16, #tpu.memory_space<vmem>>, %arg7: memref<128x32xf32, #tpu.memory_space<vmem>>) attributes {dimension_semantics = [#tpu.dimension_semantics<parallel>, #tpu.dimension_semantics<arbitrary>], iteration_bounds = array<i64: 1, 1>, scalar_prefetch = 0 : i64, scratch_operands = 1 : i64, tpu.core_type = #tpu.core_type<tc>, window_params = [{transform_indices = @transform_0, window_bounds = array<i64: 128, 128>}, {pipeline_mode = #tpu.pipeline_mode<synchronous>, transform_indices = @transform_1, window_bounds = array<i64: 128, 32>}, {pipeline_mode = #tpu.pipeline_mode<synchronous>, transform_indices = @transform_2, window_bounds = array<i64: 1, 32>}, {pipeline_mode = #tpu.pipeline_mode<synchronous>, transform_indices = @transform_3, window_bounds = array<i64: 32, 16>}, {transform_indices = @transform_4, window_bounds = array<i64: 128, 16>}]} {
    %c0_i32 = arith.constant 0 : i32
    %0 = arith.cmpi eq, %arg1, %c0_i32 : i32
    %1 = arith.extui %0 : i1 to i32
    %c0_i32_0 = arith.constant 0 : i32
    %2 = arith.cmpi ne, %1, %c0_i32_0 : i32
    scf.if %2 {
      %cst_9 = arith.constant 0.000000e+00 : f32
      %15 = vector.broadcast %cst_9 : f32 to vector<128x32xf32>
      %c0_10 = arith.constant 0 : index
      %c0_11 = arith.constant 0 : index
      %16 = vector.load %arg7[%c0_10, %c0_11] : memref<128x32xf32, #tpu.memory_space<vmem>>, vector<128x32xf32>
      tpu.vector_store %arg7[%c0_10, %c0_11], %15 {strides = array<i32>} : memref<128x32xf32, #tpu.memory_space<vmem>>, vector<128x32xf32>,
    } else {
    }
    %c128_i32 = arith.constant 128 : i32
    %3 = arith.muli %arg1, %c128_i32 : i32
    %4 = tpu.assume_multiple %3, 128 : i32
    %c0 = arith.constant 0 : index
    %c0_1 = arith.constant 0 : index
    %5 = vector.load %arg7[%c0, %c0_1] : memref<128x32xf32, #tpu.memory_space<vmem>>, vector<128x32xf32>
    %c0_2 = arith.constant 0 : index
    %c0_3 = arith.constant 0 : index
    %6 = vector.load %arg2[%c0_2, %c0_3] : memref<128x128xbf16, #tpu.memory_space<vmem>>, vector<128x128xbf16>
    %7 = arith.index_cast %4 : i32 to index
    %c0_4 = arith.constant 0 : index
    %8 = vector.load %arg3[%7, %c0_4] : memref<128x32xbf16, #tpu.memory_space<vmem>>, vector<128x32xbf16>
    %cst = arith.constant dense<0.000000e+00> : vector<128x32xf32>
    %9 = tpu.matmul %6, %8, %cst {dimension_numbers = #tpu.dot_dimension_numbers<[1], [0], [0], [1], [0, 0, 1, 1], [], []>} : vector<128x128xbf16>, vector<128x32xbf16>, vector<128x32xf32> -> vector<128x32xf32>
    %10 = arith.addf %5, %9 : vector<128x32xf32>
    %c0_5 = arith.constant 0 : index
    %c0_6 = arith.constant 0 : index
    %11 = vector.load %arg7[%c0_5, %c0_6] : memref<128x32xf32, #tpu.memory_space<vmem>>, vector<128x32xf32>
    tpu.vector_store %arg7[%c0_5, %c0_6], %10 {strides = array<i32>} : memref<128x32xf32, #tpu.memory_space<vmem>>, vector<128x32xf32>,
    %c0_i32_7 = arith.constant 0 : i32
    %12 = arith.cmpi eq, %arg1, %c0_i32_7 : i32
    %13 = arith.extui %12 : i1 to i32
    %c0_i32_8 = arith.constant 0 : i32
    %14 = arith.cmpi ne, %13, %c0_i32_8 : i32
    scf.if %14 {
      %c0_9 = arith.constant 0 : index
      %c0_10 = arith.constant 0 : index
      %15 = vector.load %arg7[%c0_9, %c0_10] : memref<128x32xf32, #tpu.memory_space<vmem>>, vector<128x32xf32>
      %c0_11 = arith.constant 0 : index
      %c0_12 = arith.constant 0 : index
      %16 = vector.load %arg4[%c0_11, %c0_12] : memref<1x32xf32, #tpu.memory_space<vmem>>, vector<1x32xf32>
      %17 = vector.broadcast %16 : vector<1x32xf32> to vector<128x32xf32>
      %18 = arith.addf %15, %17 : vector<128x32xf32>
      %cst_13 = arith.constant 0.000000e+00 : f32
      %19 = vector.broadcast %cst_13 : f32 to vector<128x32xf32>
      %20 = arith.maximumf %18, %19 : vector<128x32xf32>
      %21 = arith.truncf %20 : vector<128x32xf32> to vector<128x32xbf16>
      %c0_14 = arith.constant 0 : index
      %c0_15 = arith.constant 0 : index
      %22 = vector.load %arg5[%c0_14, %c0_15] : memref<32x16xbf16, #tpu.memory_space<vmem>>, vector<32x16xbf16>
      %cst_16 = arith.constant dense<0.000000e+00> : vector<128x16xf32>
      %23 = tpu.matmul %21, %22, %cst_16 {dimension_numbers = #tpu.dot_dimension_numbers<[1], [0], [0], [1], [0, 0, 1, 1], [], []>} : vector<128x32xbf16>, vector<32x16xbf16>, vector<128x16xf32> -> vector<128x16xf32>
      %24 = arith.truncf %23 : vector<128x16xf32> to vector<128x16xbf16>
      %c0_17 = arith.constant 0 : index
      %c0_18 = arith.constant 0 : index
      %25 = vector.load %arg6[%c0_17, %c0_18] : memref<128x16xbf16, #tpu.memory_space<vmem>>, vector<128x16xbf16>
      tpu.vector_store %arg6[%c0_17, %c0_18], %24 {strides = array<i32>} : memref<128x16xbf16, #tpu.memory_space<vmem>>, vector<128x16xbf16>,
    } else {
    }
    return
  }
  func.func @transform_0(%arg0: i32, %arg1: i32) -> (i32, i32) {
    %c0_i32 = arith.constant 0 : i32
    return %arg0, %arg1 : i32, i32
  }
  func.func @transform_1(%arg0: i32, %arg1: i32) -> (i32, i32) {
    %c0_i32 = arith.constant 0 : i32
    %c0_i32_0 = arith.constant 0 : i32
    %c0_i32_1 = arith.constant 0 : i32
    return %c0_i32, %c0_i32_0 : i32, i32
  }
  func.func @transform_2(%arg0: i32, %arg1: i32) -> (i32, i32) {
    %c0_i32 = arith.constant 0 : i32
    %c0_i32_0 = arith.constant 0 : i32
    %c0_i32_1 = arith.constant 0 : i32
    return %c0_i32, %c0_i32_0 : i32, i32
  }
  func.func @transform_3(%arg0: i32, %arg1: i32) -> (i32, i32) {
    %c0_i32 = arith.constant 0 : i32
    %c0_i32_0 = arith.constant 0 : i32
    %c0_i32_1 = arith.constant 0 : i32
    return %c0_i32, %c0_i32_0 : i32, i32
  }
  func.func @transform_4(%arg0: i32, %arg1: i32) -> (i32, i32) {
    %c0_i32 = arith.constant 0 : i32
    %c0_i32_0 = arith.constant 0 : i32
    return %arg0, %c0_i32 : i32, i32
  }
}

</mosaic_0001>

<bundles_post_ra>
// kernel: tpu_custom_call.1
= control target key start
LH: loop header
LB: loop body
LE: loop exit
PB: predicated region body
PF: predicated region fallthrough
CT: control target
= control target key end

     0   :  { %vm22_vm0 = vcmask 261120   ;;  %v571_v12 = vmov 0.0   ;;  %vm438_vm1 = vcmask 125952   ;;  %s776_s1 = inlined_call_operand.vmem [shape: bf16[128,32], index: 1, kind: input, shape index: {}]   ;;  %s777_s0 = inlined_call_operand.vmem [shape: bf16[128,128], index: 0, kind: input, shape index: {}]   ;;  %s778_s2 = inlined_call_operand.vmem [shape: f32[1,32], index: 2, kind: input, shape index: {}]   ;;  %s779_s3 = inlined_call_operand.vmem [shape: bf16[32,16], index: 3, kind: input, shape index: {}]   ;;  %s780_s4 = inlined_call_operand.vmem [shape: bf16[128,16], index: 4, kind: output, shape index: {}]  }
   0x1   :  { %v556_v0 = vld [vmem:[%s776_s1 + $0x38] sm:$0xff]  ;;  %v555_v1 = vld [vmem:[%s776_s1 + $0x30] sm:$0xff]  ;;  %v554_v2 = vld [vmem:[%s776_s1 + $0x28] sm:$0xff]  ;;  %23 = vst.msk [vmem:[#allocation2] sm:$0xff] %vm22_vm0, %v571_v12 }
   0x2   :  { %188 = vmatpush.bf16.msra.mxu0 %v556_v0  ;;  %559 = vmatpush.bf16.msra.mxu2 %v556_v0  ;;  %v553_v3 = vld [vmem:[%s776_s1 + $0x20] sm:$0xff]  ;;  %v552_v4 = vld [vmem:[%s776_s1 + $0x18] sm:$0xff]  ;;  %v551_v5 = vld [vmem:[%s776_s1 + $0x10] sm:$0xff]  ;;  %24 = vst.msk [vmem:[#allocation2 + $0x8] sm:$0xff] %vm22_vm0, %v571_v12 }
   0x3   :  { %v550_v6 = vld [vmem:[%s776_s1 + $0x8] sm:$0xff]  ;;  %v549_v7 = vld [vmem:[%s776_s1] sm:$0xff]  ;;  %25 = vst.msk [vmem:[#allocation2 + $0x10] sm:$0xff] %vm22_vm0, %v571_v12  ;;  %v543_v13 = vld [vmem:[%s777_s0 + $0x10] sm:$0xff] }
   0x4   :  { %v541_v8 = vld [vmem:[%s777_s0] sm:$0xff]  ;;  %v542_v10 = vld [vmem:[%s777_s0 + $0x8] sm:$0xff]  ;;  %26 = vst.msk [vmem:[#allocation2 + $0x18] sm:$0xff] %vm22_vm0, %v571_v12  ;;  %v547_v14 = vld [vmem:[%s777_s0 + $0x30] sm:$0xff] }
   0x5   :  { %v545_v9 = vld [vmem:[%s777_s0 + $0x20] sm:$0xff]  ;;  %v546_v11 = vld [vmem:[%s777_s0 + $0x28] sm:$0xff]  ;;  %27 = vst.msk [vmem:[#allocation2 + $0x20] sm:$0xff] %vm22_vm0, %v571_v12  ;;  %v544_v15 = vld [vmem:[%s777_s0 + $0x18] sm:$0xff] }
   0x6   :  { %189 = vmatpush.bf16.msra.mxu0 %v555_v1  ;;  %560 = vmatpush.bf16.msra.mxu2 %v555_v1  ;;  %28 = vst.msk [vmem:[#allocation2 + $0x28] sm:$0xff] %vm22_vm0, %v571_v12  ;;  %v548_v16 = vld [vmem:[%s777_s0 + $0x38] sm:$0xff]  ;;  %v558_v17 = vld [vmem:[%s779_s3 + $0x8] sm:$0xff]  ;;  %v557_v18 = vld [vmem:[%s779_s3] sm:$0xff] }
   0x7   :  { %29 = vst.msk [vmem:[#allocation2 + $0x30] sm:$0xff] %vm22_vm0, %v571_v12  ;;  %379 = vmatpush.bf16.msra.mxu1 %v558_v17  ;;  %567 = vmatpush.bf16.msra.mxu3 %v558_v17  ;;  %v673_v29 = vld [vmem:[%s778_s2] ss:$0 sm:$0xff] }
   0x8   :  { %30 = vst.msk [vmem:[#allocation2 + $0x38] sm:$0xff] %vm22_vm0, %v571_v12  ;;  %v40_v19 = vld [vmem:[#allocation2] sm:$0xff] }
   0x9   :  { %31 = vst.msk [vmem:[#allocation2 + $0x40] sm:$0xff] %vm22_vm0, %v571_v12  ;;  %v41_v24 = vld [vmem:[#allocation2 + $0x8] sm:$0xff] }
   0xa   :  { %190 = vmatpush.bf16.msra.mxu0 %v554_v2  ;;  %561 = vmatpush.bf16.msra.mxu2 %v554_v2  ;;  %32 = vst.msk [vmem:[#allocation2 + $0x48] sm:$0xff] %vm22_vm0, %v571_v12  ;;  %v42_v31 = vld [vmem:[#allocation2 + $0x10] sm:$0xff] }
   0xb   :  { %33 = vst.msk [vmem:[#allocation2 + $0x50] sm:$0xff] %vm22_vm0, %v571_v12  ;;  %380 = vmatpush.bf16.msra.mxu1 %v557_v18  ;;  %568 = vmatpush.bf16.msra.mxu3 %v557_v18  ;;  %v43_v43 = vld [vmem:[#allocation2 + $0x18] sm:$0xff] }
   0xc   :  { %34 = vst.msk [vmem:[#allocation2 + $0x58] sm:$0xff] %vm22_vm0, %v571_v12  ;;  %v44_v50 = vld [vmem:[#allocation2 + $0x20] sm:$0xff] }
   0xd   :  { %35 = vst.msk [vmem:[#allocation2 + $0x60] sm:$0xff] %vm22_vm0, %v571_v12  ;;  %v45_v63 = vld [vmem:[#allocation2 + $0x28] sm:$0xff] }
   0xe   :  { %191 = vmatpush.bf16.msra.mxu0 %v553_v3  ;;  %562 = vmatpush.bf16.msra.mxu2 %v553_v3  ;;  %36 = vst.msk [vmem:[#allocation2 + $0x68] sm:$0xff] %vm22_vm0, %v571_v12 }
   0xf   :  { %37 = vst.msk [vmem:[#allocation2 + $0x70] sm:$0xff] %vm22_vm0, %v571_v12 }
  0x10   :  { %38 = vst.msk [vmem:[#allocation2 + $0x78] sm:$0xff] %vm22_vm0, %v571_v12  ;;  %v48_v22 = vld [vmem:[#allocation2 + $0x40] sm:$0xff]  ;;  %v46_v12 = vld [vmem:[#allocation2 + $0x30] sm:$0xff] }
  0x11   :  { %v49_v28 = vld [vmem:[#allocation2 + $0x48] sm:$0xff] }
  0x12   :  { %192 = vmatpush.bf16.msra.mxu0 %v552_v4  ;;  %563 = vmatpush.bf16.msra.mxu2 %v552_v4  ;;  %v50_v39 = vld [vmem:[#allocation2 + $0x50] sm:$0xff] }
  0x13   :  { %v51_v48 = vld [vmem:[#allocation2 + $0x58] sm:$0xff] }
  0x14   :  { %v52_v58 = vld [vmem:[#allocation2 + $0x60] sm:$0xff] }
  0x16   :  { %193 = vmatpush.bf16.msra.mxu0 %v551_v5  ;;  %564 = vmatpush.bf16.msra.mxu2 %v551_v5 }
  0x1a   :  { %194 = vmatpush.bf16.msra.mxu0 %v550_v6  ;;  %565 = vmatpush.bf16.msra.mxu2 %v550_v6 }
  0x1e   :  { %195 = vmatpush.bf16.msra.mxu0 %v549_v7  ;;  %566 = vmatpush.bf16.msra.mxu2 %v549_v7 }
  0x21   :  { %196 = vmatmul.bf16.vlgmr.msra.gmra.mxu0 %v541_v8  ;;  %216 = vmatmul.bf16.vlgmr.msra.gmra.mxu2 %v545_v9  ;;  %v53_v9 = vld [vmem:[#allocation2 + $0x68] sm:$0xff] }
  0x31   :  { %201 = vmatmul.bf16.gmra.mxu0 %v542_v10  ;;  %221 = vmatmul.bf16.gmra.mxu2 %v546_v11 }
  0x41   :  { %206 = vmatmul.bf16.gmra.mxu0 %v543_v13  ;;  %226 = vmatmul.bf16.gmra.mxu2 %v547_v14 }
  0x51   :  { %211 = vmatmul.bf16.gmra.mxu0 %v544_v15  ;;  %231 = vmatmul.bf16.gmra.mxu2 %v548_v16 }
  0x9e   :  { %v197_v20 = vpop.f32.mrf.mxu0 }
  0x9f   :  { %v237_v21 = vadd.f32 %v197_v20, %v40_v19  ;;  %v54_v20 = vld [vmem:[#allocation2 + $0x70] sm:$0xff] }
  0xa1   :  { %254 = vst.msk [vmem:[#allocation2] sm:$0xff] %vm22_vm0, %v237_v21 }
  0xa4   :  { %v217_v23 = vpop.f32.mrf.mxu2 }
  0xa5   :  { %v245_v25 = vadd.f32 %v217_v23, %v48_v22 }
  0xa6   :  { %v199_v26 = vpop.f32.mrf.mxu0 }
  0xa7   :  { %262 = vst.msk [vmem:[#allocation2 + $0x40] sm:$0xff] %vm22_vm0, %v245_v25  ;;  %v238_v27 = vadd.f32 %v199_v26, %v41_v24  ;;  %v47_v25 = vld [vmem:[#allocation2 + $0x38] sm:$0xff] }
  0xa8   :  { %v273_v32 = vld [vmem:[#allocation2] sm:$0xff] }
  0xa9   :  { %255 = vst.msk [vmem:[#allocation2 + $0x8] sm:$0xff] %vm22_vm0, %v238_v27  ;;  %v293_v36 = vadd.f32 %v673_v29, %v273_v32 }
  0xab   :  { %v309_v40 = vmax.f32 %v293_v36, 0.0  ;;  %v55_v36 = vld [vmem:[#allocation2 + $0x78] sm:$0xff] }
  0xac   :  { %v219_v30 = vpop.f32.mrf.mxu2 }
  0xad   :  { %v246_v33 = vadd.f32 %v219_v30, %v49_v28 }
  0xae   :  { %v202_v34 = vpop.f32.mrf.mxu0 }
  0xaf   :  { %263 = vst.msk [vmem:[#allocation2 + $0x48] sm:$0xff] %vm22_vm0, %v246_v33  ;;  %v239_v35 = vadd.f32 %v202_v34, %v42_v31 }
  0xb0   :  { %v274_v37 = vld [vmem:[#allocation2 + $0x8] sm:$0xff] }
  0xb1   :  { %256 = vst.msk [vmem:[#allocation2 + $0x10] sm:$0xff] %vm22_vm0, %v239_v35  ;;  %v294_v38 = vadd.f32 %v673_v29, %v274_v37 }
  0xb3   :  { %v310_v41 = vmax.f32 %v294_v38, 0.0 }
  0xb4   :  { %v222_v42 = vpop.f32.mrf.mxu2 }
  0xb5   :  { %v247_v44 = vadd.f32 %v222_v42, %v50_v39  ;;  %v325_v45 = vpack.c.bf16 %v310_v41, %v309_v40 }
  0xb6   :  { %v204_v46 = vpop.f32.mrf.mxu0 }
  0xb7   :  { %264 = vst.msk [vmem:[#allocation2 + $0x50] sm:$0xff] %vm22_vm0, %v247_v44  ;;  %v240_v47 = vadd.f32 %v204_v46, %v43_v43  ;;  %533 = vmatmul.msk.bf16.vlgmr.msra.gmra.mxu1 %vm22_vm0, %v325_v45 }
  0xb8   :  { %v275_v51 = vld [vmem:[#allocation2 + $0x10] sm:$0xff] }
  0xb9   :  { %257 = vst.msk [vmem:[#allocation2 + $0x18] sm:$0xff] %vm22_vm0, %v240_v47  ;;  %v295_v55 = vadd.f32 %v673_v29, %v275_v51 }
  0xbb   :  { %v311_v60 = vmax.f32 %v295_v55, 0.0  ;;  %v281_v55 = vld [vmem:[#allocation2 + $0x40] sm:$0xff] }
  0xbc   :  { %v224_v49 = vpop.f32.mrf.mxu2 }
  0xbd   :  { %v248_v52 = vadd.f32 %v224_v49, %v51_v48 }
  0xbe   :  { %v207_v53 = vpop.f32.mrf.mxu0  ;;  %v283_v59 = vld [vmem:[#allocation2 + $0x50] sm:$0xff] }
  0xbf   :  { %265 = vst.msk [vmem:[#allocation2 + $0x58] sm:$0xff] %vm22_vm0, %v248_v52  ;;  %v241_v54 = vadd.f32 %v207_v53, %v44_v50  ;;  %v303_v2 = vadd.f32 %v673_v29, %v283_v59  ;;  %v282_v53 = vld [vmem:[#allocation2 + $0x48] sm:$0xff] }
  0xc0   :  { %v276_v56 = vld [vmem:[#allocation2 + $0x18] sm:$0xff] }
  0xc1   :  { %258 = vst.msk [vmem:[#allocation2 + $0x20] sm:$0xff] %vm22_vm0, %v241_v54  ;;  %v296_v57 = vadd.f32 %v673_v29, %v276_v56  ;;  %v319_v7 = vmax.f32 %v303_v2, 0.0  ;;  %v302_v56 = vadd.f32 %v673_v29, %v282_v53 }
  0xc3   :  { %v312_v61 = vmax.f32 %v296_v57, 0.0  ;;  %v301_v57 = vadd.f32 %v673_v29, %v281_v55 }
  0xc4   :  { %v227_v62 = vpop.f32.mrf.mxu2 }
  0xc5   :  { %v249_v0 = vadd.f32 %v227_v62, %v52_v58  ;;  %v326_v1 = vpack.c.bf16 %v312_v61, %v311_v60  ;;  %v318_v58 = vmax.f32 %v302_v56, 0.0  ;;  %v317_v59 = vmax.f32 %v301_v57, 0.0 }
  0xc6   :  { %v209_v3 = vpop.f32.mrf.mxu0  ;;  %v284_v4 = vld [vmem:[#allocation2 + $0x58] sm:$0xff] }
  0xc7   :  { %266 = vst.msk [vmem:[#allocation2 + $0x60] sm:$0xff] %vm22_vm0, %v249_v0  ;;  %v242_v5 = vadd.f32 %v209_v3, %v45_v63  ;;  %534 = vmatmul.msk.bf16.gmra.mxu1 %vm22_vm0, %v326_v1  ;;  %v304_v6 = vadd.f32 %v673_v29, %v284_v4  ;;  %v329_v60 = vpack.c.bf16 %v318_v58, %v317_v59 }
  0xc8   :  { %v277_v13 = vld [vmem:[#allocation2 + $0x20] sm:$0xff] }
  0xc9   :  { %259 = vst.msk [vmem:[#allocation2 + $0x28] sm:$0xff] %vm22_vm0, %v242_v5  ;;  %v320_v8 = vmax.f32 %v304_v6, 0.0  ;;  %v297_v17 = vadd.f32 %v673_v29, %v277_v13 }
  0xcb   :  { %v330_v10 = vpack.c.bf16 %v320_v8, %v319_v7  ;;  %v313_v22 = vmax.f32 %v297_v17, 0.0 }
  0xcc   :  { %v229_v11 = vpop.f32.mrf.mxu2 }
  0xcd   :  { %v250_v14 = vadd.f32 %v229_v11, %v53_v9  ;;  %538 = vmatmul.msk.bf16.vlgmr.msra.gmra.mxu3 %vm22_vm0, %v330_v10 }
  0xce   :  { %v212_v15 = vpop.f32.mrf.mxu0  ;;  %v285_v21 = vld [vmem:[#allocation2 + $0x60] sm:$0xff] }
  0xcf   :  { %267 = vst.msk [vmem:[#allocation2 + $0x68] sm:$0xff] %vm22_vm0, %v250_v14  ;;  %v243_v16 = vadd.f32 %v212_v15, %v46_v12  ;;  %v305_v28 = vadd.f32 %v673_v29, %v285_v21 }
  0xd0   :  { %v278_v18 = vld [vmem:[#allocation2 + $0x28] sm:$0xff] }
  0xd1   :  { %260 = vst.msk [vmem:[#allocation2 + $0x30] sm:$0xff] %vm22_vm0, %v243_v16  ;;  %v298_v19 = vadd.f32 %v673_v29, %v278_v18  ;;  %v321_v34 = vmax.f32 %v305_v28, 0.0 }
  0xd3   :  { %v314_v23 = vmax.f32 %v298_v19, 0.0 }
  0xd4   :  { %v232_v24 = vpop.f32.mrf.mxu2 }
  0xd5   :  { %v251_v26 = vadd.f32 %v232_v24, %v54_v20  ;;  %v327_v27 = vpack.c.bf16 %v314_v23, %v313_v22 }
  0xd6   :  { %v214_v30 = vpop.f32.mrf.mxu0  ;;  %v286_v31 = vld [vmem:[#allocation2 + $0x68] sm:$0xff] }
  0xd7   :  { %268 = vst.msk [vmem:[#allocation2 + $0x70] sm:$0xff] %vm22_vm0, %v251_v26  ;;  %v244_v32 = vadd.f32 %v214_v30, %v47_v25  ;;  %535 = vmatmul.msk.bf16.gmra.mxu1 %vm22_vm0, %v327_v27  ;;  %v306_v33 = vadd.f32 %v673_v29, %v286_v31 }
  0xd8   :  { %v279_v39 = vld [vmem:[#allocation2 + $0x30] sm:$0xff] }
  0xd9   :  { %261 = vst.msk [vmem:[#allocation2 + $0x38] sm:$0xff] %vm22_vm0, %v244_v32  ;;  %v322_v35 = vmax.f32 %v306_v33, 0.0  ;;  %v299_v41 = vadd.f32 %v673_v29, %v279_v39 }
  0xdb   :  { %v331_v37 = vpack.c.bf16 %v322_v35, %v321_v34  ;;  %v315_v45 = vmax.f32 %v299_v41, 0.0 }
  0xdc   :  { %v234_v38 = vpop.f32.mrf.mxu2 }
  0xdd   :  { %v252_v40 = vadd.f32 %v234_v38, %v55_v36  ;;  %539 = vmatmul.msk.bf16.gmra.mxu3 %vm22_vm0, %v331_v37 }
  0xde   :  { %v287_v44 = vld [vmem:[#allocation2 + $0x70] sm:$0xff] }
  0xdf   :  { %269 = vst.msk [vmem:[#allocation2 + $0x78] sm:$0xff] %vm22_vm0, %v252_v40  ;;  %v307_v48 = vadd.f32 %v673_v29, %v287_v44 }
  0xe0   :  { %v280_v42 = vld [vmem:[#allocation2 + $0x38] sm:$0xff] }
  0xe1   :  { %v300_v43 = vadd.f32 %v673_v29, %v280_v42  ;;  %v323_v51 = vmax.f32 %v307_v48, 0.0 }
  0xe3   :  { %v316_v46 = vmax.f32 %v300_v43, 0.0 }
  0xe5   :  { %v328_v47 = vpack.c.bf16 %v316_v46, %v315_v45 }
  0xe6   :  { %v288_v49 = vld [vmem:[#allocation2 + $0x78] sm:$0xff] }
  0xe7   :  { %536 = vmatmul.msk.bf16.gmra.mxu1 %vm22_vm0, %v328_v47  ;;  %v308_v50 = vadd.f32 %v673_v29, %v288_v49 }
  0xe9   :  { %v324_v52 = vmax.f32 %v308_v50, 0.0 }
  0xeb   :  { %v332_v54 = vpack.c.bf16 %v324_v52, %v323_v51 }
  0xed   :  { %540 = vmatmul.msk.bf16.gmra.mxu3 %vm22_vm0, %v332_v54 }
  0xf7   :  { %537 = vmatmul.msk.bf16.gmra.mxu1 %vm22_vm0, %v329_v60 }
 0x134   :  { %v382_v61 = vpop.f32.mrf.mxu1 }
 0x135   :  { %v422_v62 = vpack.c.bf16 %v382_v61, %v382_v61 }
 0x137   :  { %439 = vst.msk [vmem:[%s780_s4] sm:$0xf] %vm438_vm1, %v422_v62 }
 0x13c   :  { %v384_v63 = vpop.f32.mrf.mxu1 }
 0x13d   :  { %v423_v0 = vpack.c.bf16 %v384_v63, %v384_v63 }
 0x13f   :  { %440 = vst.msk [vmem:[%s780_s4 + $0x4] sm:$0xf] %vm438_vm1, %v423_v0 }
 0x144   :  { %v387_v29 = vpop.f32.mrf.mxu1 }
 0x145   :  { %v424_v1 = vpack.c.bf16 %v387_v29, %v387_v29 }
 0x147   :  { %441 = vst.msk [vmem:[%s780_s4 + $0x8] sm:$0xf] %vm438_vm1, %v424_v1 }
 0x14c   :  { %v389_v2 = vpop.f32.mrf.mxu1 }
 0x14d   :  { %v425_v3 = vpack.c.bf16 %v389_v2, %v389_v2 }
 0x14f   :  { %442 = vst.msk [vmem:[%s780_s4 + $0xc] sm:$0xf] %vm438_vm1, %v425_v3 }
 0x150   :  { %v407_v4 = vpop.f32.mrf.mxu3 }
 0x151   :  { %v432_v5 = vpack.c.bf16 %v407_v4, %v407_v4 }
 0x153   :  { %449 = vst.msk [vmem:[%s780_s4 + $0x28] sm:$0xf] %vm438_vm1, %v432_v5 }
 0x154   :  { %v392_v6 = vpop.f32.mrf.mxu1 }
 0x155   :  { %v426_v7 = vpack.c.bf16 %v392_v6, %v392_v6 }
 0x157   :  { %443 = vst.msk [vmem:[%s780_s4 + $0x10] sm:$0xf] %vm438_vm1, %v426_v7 }
 0x158   :  { %v409_v8 = vpop.f32.mrf.mxu3 }
 0x159   :  { %v433_v9 = vpack.c.bf16 %v409_v8, %v409_v8 }
 0x15b   :  { %450 = vst.msk [vmem:[%s780_s4 + $0x2c] sm:$0xf] %vm438_vm1, %v433_v9 }
 0x15c   :  { %v394_v10 = vpop.f32.mrf.mxu1 }
 0x15d   :  { %v427_v11 = vpack.c.bf16 %v394_v10, %v394_v10 }
 0x15f   :  { %444 = vst.msk [vmem:[%s780_s4 + $0x14] sm:$0xf] %vm438_vm1, %v427_v11 }
 0x160   :  { %v412_v12 = vpop.f32.mrf.mxu3 }
 0x161   :  { %v434_v13 = vpack.c.bf16 %v412_v12, %v412_v12 }
 0x163   :  { %451 = vst.msk [vmem:[%s780_s4 + $0x30] sm:$0xf] %vm438_vm1, %v434_v13 }
 0x164   :  { %v397_v14 = vpop.f32.mrf.mxu1 }
 0x165   :  { %v428_v15 = vpack.c.bf16 %v397_v14, %v397_v14 }
 0x167   :  { %445 = vst.msk [vmem:[%s780_s4 + $0x18] sm:$0xf] %vm438_vm1, %v428_v15 }
 0x168   :  { %v414_v16 = vpop.f32.mrf.mxu3 }
 0x169   :  { %v435_v17 = vpack.c.bf16 %v414_v16, %v414_v16 }
 0x16b   :  { %452 = vst.msk [vmem:[%s780_s4 + $0x34] sm:$0xf] %vm438_vm1, %v435_v17 }
 0x16c   :  { %v399_v18 = vpop.f32.mrf.mxu1 }
 0x16d   :  { %v429_v19 = vpack.c.bf16 %v399_v18, %v399_v18 }
 0x16f   :  { %446 = vst.msk [vmem:[%s780_s4 + $0x1c] sm:$0xf] %vm438_vm1, %v429_v19 }
 0x170   :  { %v417_v20 = vpop.f32.mrf.mxu3 }
 0x171   :  { %v436_v21 = vpack.c.bf16 %v417_v20, %v417_v20 }
 0x173   :  { %453 = vst.msk [vmem:[%s780_s4 + $0x38] sm:$0xf] %vm438_vm1, %v436_v21 }
 0x174   :  { %v402_v22 = vpop.f32.mrf.mxu1 }
 0x175   :  { %v430_v23 = vpack.c.bf16 %v402_v22, %v402_v22 }
 0x177   :  { %447 = vst.msk [vmem:[%s780_s4 + $0x20] sm:$0xf] %vm438_vm1, %v430_v23 }
 0x178   :  { %v419_v24 = vpop.f32.mrf.mxu3 }
 0x179   :  { %v437_v25 = vpack.c.bf16 %v419_v24, %v419_v24 }
 0x17b   :  { %454 = vst.msk [vmem:[%s780_s4 + $0x3c] sm:$0xf] %vm438_vm1, %v437_v25 }
 0x17c   :  { %v404_v26 = vpop.f32.mrf.mxu1 }
 0x17d   :  { %v431_v27 = vpack.c.bf16 %v404_v26, %v404_v26 }
 0x17f   :  { %448 = vst.msk [vmem:[%s780_s4 + $0x24] sm:$0xf] %vm438_vm1, %v431_v27 }

</bundles_post_ra>
